<compile_context>
chip_gen: v5e
topology: v5e:2x2
jax: 0.10.0
libtpu: 0.0.40
codegen_flags: <defaults>
</compile_context>

<pallas_src>
import functools

import jax
import jax.numpy as jnp
from jax.experimental import pallas as pl
from jax.experimental.pallas import tpu as pltpu

BN_EPS = 1e-5


def _round_up(x, m):
    return (x + m - 1) // m * m


def _cdiv(a, b):
    return -(-a // b)


# ------------------------------ Pallas kernels -------------------------------
def _conv_stats_kernel(xl_ref, xr_ref, w_ref, mask_ref, acc_ref, mean_ref, ssq_ref,
                       *, taps, halo):
    """Pass 1: in-kernel 3x3 taps (9 shifted MXU matmuls) + per-tile BN partials.

    xl_ref   : (Cin2, tm)        tile i   of the flattened padded spectral tensor
    xr_ref   : (Cin2, tm)        tile i+1 (supplies the right halo)
    w_ref    : (9, N, Cin2)      per-tap conv weights (f32, resident)
    mask_ref : (1, tm)           1.0 for interior (valid) columns, else 0.0
    acc_ref  : (N, tm)           raw conv output tile (storage dtype)
    mean_ref : (1, N, 1)         per-tile per-channel mean over valid columns
    ssq_ref  : (1, N, 1)         per-tile per-channel centered sum of squares
    """
    tm = xl_ref.shape[1]
    n_out = w_ref.shape[1]

    # Haloed window of the padded flattened spectral tensor; widen once to f32 in
    # VMEM (HBM storage stays narrow).
    win = jnp.concatenate(
        [xl_ref[...].astype(jnp.float32), xr_ref[...].astype(jnp.float32)], axis=1)

    # 9 shifted matmuls replace the materialized im2col.  `halo + off` is a static
    # Python int in [0, 2*halo] <= tm, so every slice stays inside `win`.
    acc = jnp.zeros((n_out, tm), jnp.float32)
    for t, off in enumerate(taps):
        s = halo + off
        acc = acc + jnp.dot(w_ref[t], win[:, s:s + tm],
                            preferred_element_type=jnp.float32)
    acc_ref[...] = acc.astype(acc_ref.dtype)

    # Per-tile BatchNorm partials over valid columns, centered at the tile mean
    # (merged host-side with the exact parallel-variance formula).
    vmask = mask_ref[...]                                           # (1, tm)
    n = jnp.sum(vmask)
    mean_t = jnp.sum(acc * vmask, axis=1, keepdims=True) / jnp.maximum(n, 1.0)
    cen = (acc - mean_t) * vmask
    mean_ref[...] = mean_t.reshape(1, n_out, 1)
    ssq_ref[...] = jnp.sum(cen * cen, axis=1, keepdims=True).reshape(1, n_out, 1)


def _bn_relu_kernel(acc_ref, scale_ref, shift_ref, o_ref):
    """Pass 2: fused folded-BatchNorm (scale/shift FMA in f32) + ReLU, lane-dense."""
    y = acc_ref[...].astype(jnp.float32) * scale_ref[...] + shift_ref[...]
    o_ref[...] = jnp.maximum(y, 0.0).astype(o_ref.dtype)


# --------------------------- wrapper / glue (JAX) ------------------------------
def _pick_tm(mp, halo, tm):
    # Large tiles amortize the ~0.35us per-grid-step overhead and lengthen DMA
    # bursts; cap at 1024 (fits easily under the 32 MiB scoped VMEM limit on
    # v5e/v6e/v7x) but aim for >= 2 tiles so both v7x TensorCores get work.
    min_tm = _round_up(max(2 * halo, 128), 128)   # halo window must fit two tiles
    if tm is None:
        tm = min(1024, _round_up(_cdiv(mp, 2), 128))
    tm = max(_round_up(tm, 128), min_tm)
    return tm


def fourier_convolution(x, conv_w, conv_b, bn_gamma, bn_beta, *, kernel_size=3,
                        tm=None, storage_dtype=jnp.bfloat16, out_dtype=jnp.float32,
                        eps=BN_EPS):
    """x: (B, C, H, W) float32 NCHW (matching the PyTorch module). Returns (B, C, H, W)."""
    del conv_b  # exactly cancelled by training-mode BatchNorm mean subtraction
    B, C, H, W = x.shape
    n_out, cin2, ks, _ = conv_w.shape
    assert ks == kernel_size and ks % 2 == 1
    pad = ks // 2

    # rfft2 with norm='forward', stack real/imag along channels (torch.hstack).
    ffted = jnp.fft.rfft2(x, norm="forward")                        # (B, C, H, Wf)
    Wf = ffted.shape[-1]
    spec = jnp.concatenate([ffted.real, ffted.imag], axis=1)        # (B, Cin2, H, Wf)
    assert spec.shape[1] == cin2

    # Cast to the narrow storage dtype BEFORE the single pad+transpose layout pass
    # so XLA emits one fused copy (no separate cast / pad / im2col passes).
    spec = spec.astype(storage_dtype)
    Hp, Wfp = H + 2 * pad, Wf + 2 * pad
    spec_p = jnp.pad(spec, ((0, 0), (0, 0), (pad, pad), (pad, pad)))
    xflat = jnp.transpose(spec_p, (1, 0, 2, 3)).reshape(cin2, B * Hp * Wfp)

    mp = B * Hp * Wfp                    # number of padded spatial positions
    halo = pad * Wfp + pad               # max |tap offset| in flattened columns
    tm = _pick_tm(mp, halo, tm)
    num_tiles = _cdiv(mp, tm)
    lt = num_tiles * tm                  # conv-output columns (>= mp)
    lg = lt + tm                         # xg length (extra tile feeds the right halo)
    # xg column j corresponds to padded spatial column j - halo (left halo of zeros).
    xg = jnp.pad(xflat, ((0, 0), (halo, lg - halo - mp)))

    # 3x3 taps as uniform flattened-column offsets; weights as (ks*ks, N, Cin2) f32
    # (tiny, kept resident across the grid).
    taps = tuple((ky - pad) * Wfp + (kx - pad)
                 for ky in range(ks) for kx in range(ks))
    w_taps = jnp.transpose(conv_w, (2, 3, 0, 1)).reshape(ks * ks, n_out, cin2)
    w_taps = w_taps.astype(jnp.float32)

    # Validity mask over conv-output columns: interior (non-halo, non-tail) positions.
    col = jnp.arange(lt, dtype=jnp.int32)
    xx = col % Wfp
    yy = (col // Wfp) % Hp
    valid = ((col < mp) & (xx >= pad) & (xx < Wfp - pad)
             & (yy >= pad) & (yy < Hp - pad))
    vmask = valid.astype(jnp.float32).reshape(1, lt)

    cparams = pltpu.CompilerParams(
        dimension_semantics=("parallel",),       # disjoint output blocks per tile
        vmem_limit_bytes=32 * 1024 * 1024,       # safe on v5e/v6e/v7x
    )

    # ---- pass 1: in-kernel taps + MXU matmul (f32 acc) + per-tile BN partials ----
    kern1 = functools.partial(_conv_stats_kernel, taps=taps, halo=halo)
    acc, means, ssqs = pl.pallas_call(
        kern1,
        out_shape=(
            jax.ShapeDtypeStruct((n_out, lt), storage_dtype),
            jax.ShapeDtypeStruct((num_tiles, n_out, 1), jnp.float32),
            jax.ShapeDtypeStruct((num_tiles, n_out, 1), jnp.float32),
        ),
        grid=(num_tiles,),
        in_specs=[
            pl.BlockSpec((cin2, tm), lambda i: (0, i)),            # tile i
            pl.BlockSpec((cin2, tm), lambda i: (0, i + 1)),        # tile i+1 (halo)
            pl.BlockSpec((ks * ks, n_out, cin2), lambda i: (0, 0, 0)),
            pl.BlockSpec((1, tm), lambda i: (0, i)),
        ],
        out_specs=(
            pl.BlockSpec((n_out, tm), lambda i: (0, i)),
            pl.BlockSpec((1, n_out, 1), lambda i: (i, 0, 0)),
            pl.BlockSpec((1, n_out, 1), lambda i: (i, 0, 0)),
        ),
        compiler_params=cparams,
    )(xg, xg, w_taps, vmask)

    # ---- exact Welford-style merge of per-tile (count, mean, centered ssq) ----
    m_valid = float(B * H * Wf)
    n_t = jnp.sum(vmask.reshape(num_tiles, tm), axis=1)             # (T,) same mask
    mean_t = means[:, :, 0]                                         # (T, N)
    ss_t = ssqs[:, :, 0]                                            # (T, N)
    mean = jnp.sum(n_t[:, None] * mean_t, axis=0) / m_valid
    m2 = jnp.sum(ss_t, axis=0) + jnp.sum(
        n_t[:, None] * (mean_t - mean[None, :]) ** 2, axis=0)
    var = m2 / m_valid                                              # biased (train BN)
    scale = bn_gamma * jax.lax.rsqrt(var + eps)
    shift = bn_beta - mean * scale

    # ---- pass 2: fused scale/shift + ReLU over the same lane-dense tiles ----
    alias = {0: 0} if jnp.dtype(storage_dtype) == jnp.dtype(out_dtype) else {}
    out = pl.pallas_call(
        _bn_relu_kernel,
        out_shape=jax.ShapeDtypeStruct((n_out, lt), out_dtype),
        grid=(num_tiles,),
        in_specs=[
            pl.BlockSpec((n_out, tm), lambda i: (0, i)),
            pl.BlockSpec((n_out, 1), lambda i: (0, 0)),
            pl.BlockSpec((n_out, 1), lambda i: (0, 0)),
        ],
        out_specs=pl.BlockSpec((n_out, tm), lambda i: (0, i)),
        input_output_aliases=alias,
        compiler_params=cparams,
    )(acc, scale.reshape(n_out, 1).astype(jnp.float32),
      shift.reshape(n_out, 1).astype(jnp.float32))

    # Drop padding/halo columns, back to NCHW spectral layout, inverse FFT.
    out = out[:, :mp].reshape(n_out, B, Hp, Wfp)[:, :, pad:pad + H, pad:pad + Wf]
    out = jnp.transpose(out, (1, 0, 2, 3)).astype(jnp.float32)      # (B, Cout2, H, Wf)
    real, imag = out[:, :C], out[:, C:]
    return jnp.fft.irfft2(real + 1j * imag, s=(H, W), norm="forward")


# ------------------------- pure-JAX reference check ---------------------------
def _reference(x, conv_w, conv_b, bn_gamma, bn_beta):
    B, C, H, W = x.shape
    ffted = jnp.fft.rfft2(x, norm="forward")
    spec = jnp.concatenate([ffted.real, ffted.imag], axis=1).astype(jnp.float32)
    conv = jax.lax.conv_general_dilated(
        spec, conv_w, window_strides=(1, 1), padding="SAME",
        dimension_numbers=("NCHW", "OIHW", "NCHW"),
        precision=jax.lax.Precision.HIGHEST)
    conv = conv + conv_b.reshape(1, -1, 1, 1)
    mean = jnp.mean(conv, axis=(0, 2, 3), keepdims=True)
    var = jnp.mean((conv - mean) ** 2, axis=(0, 2, 3), keepdims=True)
    bn = (conv - mean) * jax.lax.rsqrt(var + BN_EPS)
    bn = bn * bn_gamma.reshape(1, -1, 1, 1) + bn_beta.reshape(1, -1, 1, 1)
    act = jnp.maximum(bn, 0.0)
    z = act[:, :C] + 1j * act[:, C:]
    return jnp.fft.irfft2(z, s=(H, W), norm="forward")


# ---------------------------------- main --------------------------------------
if __name__ == "__main__":
    B, C, H, W = 2, 4, 16, 16      # in_channels == out_channels (required by slicing)
    ks = 3
    cin2, cout2 = 2 * C, 2 * C

    key = jax.random.PRNGKey(0)
    kx, kw, kb, kg, kbe = jax.random.split(key, 5)

    x = jax.random.normal(kx, (B, C, H, W), dtype=jnp.float32)

    fan_in = cin2 * ks * ks
    bound = 1.0 / (fan_in ** 0.5)
    conv_w = jax.random.uniform(kw, (cout2, cin2, ks, ks), jnp.float32, -bound, bound)
    conv_b = jax.random.uniform(kb, (cout2,), jnp.float32, -bound, bound)
    bn_gamma = 1.0 + 0.1 * jax.random.normal(kg, (cout2,), dtype=jnp.float32)
    bn_beta = 0.1 * jax.random.normal(kbe, (cout2,), dtype=jnp.float32)

    ref = jax.block_until_ready(_reference(x, conv_w, conv_b, bn_gamma, bn_beta))

    # f32 storage path: tight check.  Default tile pick gives 2 tiles here, which
    # exercises cross-tile halo taps, the masked Welford merge, and M padding.
    fwd_f32 = jax.jit(functools.partial(fourier_convolution, kernel_size=ks,
                                        storage_dtype=jnp.float32))
    out_f32 = jax.block_until_ready(fwd_f32(x, conv_w, conv_b, bn_gamma, bn_beta))
    assert out_f32.shape == (B, C, H, W) and out_f32.dtype == jnp.float32
    rel_f32 = float(jnp.linalg.norm(out_f32 - ref) / jnp.linalg.norm(ref))
    assert rel_f32 < 2e-3, rel_f32

    # default path: bf16 HBM storage for the spectral tensor and the inter-pass conv
    # accumulator (f32 MXU accumulation + f32 BN statistics inside the kernel).
    fwd = jax.jit(functools.partial(fourier_convolution, kernel_size=ks))
    out = jax.block_until_ready(fwd(x, conv_w, conv_b, bn_gamma, bn_beta))
    assert out.shape == (B, C, H, W)
    rel = float(jnp.linalg.norm(out - ref) / jnp.linalg.norm(ref))
    assert rel < 5e-2, rel

    print("KERNEL_OK")
</pallas_src>

<mosaic_0001>
module attributes {stable_mosaic.version = 11 : i64} {
  func.func @_conv_stats_kernel(%arg0: i32, %arg1: memref<8x256xf32, #tpu.memory_space<vmem>>, %arg2: memref<8x256xf32, #tpu.memory_space<vmem>>, %arg3: memref<9x8x8xf32, #tpu.memory_space<vmem>>, %arg4: memref<1x256xf32, #tpu.memory_space<vmem>>, %arg5: memref<8x256xf32, #tpu.memory_space<vmem>>, %arg6: memref<1x8x1xf32, #tpu.memory_space<vmem>>, %arg7: memref<1x8x1xf32, #tpu.memory_space<vmem>>) attributes {dimension_semantics = [#tpu.dimension_semantics<parallel>], iteration_bounds = array<i64: 2>, scalar_prefetch = 0 : i64, scratch_operands = 0 : i64, tpu.core_type = #tpu.core_type<tc>, window_params = [{transform_indices = @transform_0, window_bounds = array<i64: 8, 256>}, {transform_indices = @transform_1, window_bounds = array<i64: 8, 256>}, {pipeline_mode = #tpu.pipeline_mode<synchronous>, transform_indices = @transform_2, window_bounds = array<i64: 9, 8, 8>}, {transform_indices = @transform_3, window_bounds = array<i64: 1, 256>}, {transform_indices = @transform_4, window_bounds = array<i64: 8, 256>}, {transform_indices = @transform_5, window_bounds = array<i64: 1, 8, 1>}, {transform_indices = @transform_6, window_bounds = array<i64: 1, 8, 1>}]} {
    %c0 = arith.constant 0 : index
    %c0_0 = arith.constant 0 : index
    %0 = vector.load %arg1[%c0, %c0_0] : memref<8x256xf32, #tpu.memory_space<vmem>>, vector<8x256xf32>
    %c0_1 = arith.constant 0 : index
    %c0_2 = arith.constant 0 : index
    %1 = vector.load %arg2[%c0_1, %c0_2] : memref<8x256xf32, #tpu.memory_space<vmem>>, vector<8x256xf32>
    %2 = tpu.concatenate %0, %1 in 1 : vector<8x256xf32>, vector<8x256xf32> -> vector<8x512xf32>
    %cst = arith.constant 0.000000e+00 : f32
    %3 = vector.broadcast %cst : f32 to vector<8x256xf32>
    %c0_3 = arith.constant 0 : index
    %c0_4 = arith.constant 0 : index
    %c0_5 = arith.constant 0 : index
    %4 = vector.load %arg3[%c0_3, %c0_4, %c0_5] : memref<9x8x8xf32, #tpu.memory_space<vmem>>, vector<1x8x8xf32>
    %5 = vector.shape_cast %4 : vector<1x8x8xf32> to vector<8x8xf32>
    %6 = vector.extract_strided_slice %2 {offsets = [0, 0], sizes = [8, 256], strides = [1, 1]} : vector<8x512xf32> to vector<8x256xf32>
    %cst_6 = arith.constant dense<0.000000e+00> : vector<8x256xf32>
    %7 = tpu.matmul %5, %6, %cst_6 {dimension_numbers = #tpu.dot_dimension_numbers<[1], [0], [0], [1], [0, 0, 1, 1], [], []>} : vector<8x8xf32>, vector<8x256xf32>, vector<8x256xf32> -> vector<8x256xf32>
    %8 = arith.addf %3, %7 : vector<8x256xf32>
    %c1 = arith.constant 1 : index
    %c0_7 = arith.constant 0 : index
    %c0_8 = arith.constant 0 : index
    %9 = vector.load %arg3[%c1, %c0_7, %c0_8] : memref<9x8x8xf32, #tpu.memory_space<vmem>>, vector<1x8x8xf32>
    %10 = vector.shape_cast %9 : vector<1x8x8xf32> to vector<8x8xf32>
    %11 = vector.extract_strided_slice %2 {offsets = [0, 1], sizes = [8, 256], strides = [1, 1]} : vector<8x512xf32> to vector<8x256xf32>
    %cst_9 = arith.constant dense<0.000000e+00> : vector<8x256xf32>
    %12 = tpu.matmul %10, %11, %cst_9 {dimension_numbers = #tpu.dot_dimension_numbers<[1], [0], [0], [1], [0, 0, 1, 1], [], []>} : vector<8x8xf32>, vector<8x256xf32>, vector<8x256xf32> -> vector<8x256xf32>
    %13 = arith.addf %8, %12 : vector<8x256xf32>
    %c2 = arith.constant 2 : index
    %c0_10 = arith.constant 0 : index
    %c0_11 = arith.constant 0 : index
    %14 = vector.load %arg3[%c2, %c0_10, %c0_11] : memref<9x8x8xf32, #tpu.memory_space<vmem>>, vector<1x8x8xf32>
    %15 = vector.shape_cast %14 : vector<1x8x8xf32> to vector<8x8xf32>
    %16 = vector.extract_strided_slice %2 {offsets = [0, 2], sizes = [8, 256], strides = [1, 1]} : vector<8x512xf32> to vector<8x256xf32>
    %cst_12 = arith.constant dense<0.000000e+00> : vector<8x256xf32>
    %17 = tpu.matmul %15, %16, %cst_12 {dimension_numbers = #tpu.dot_dimension_numbers<[1], [0], [0], [1], [0, 0, 1, 1], [], []>} : vector<8x8xf32>, vector<8x256xf32>, vector<8x256xf32> -> vector<8x256xf32>
    %18 = arith.addf %13, %17 : vector<8x256xf32>
    %c3 = arith.constant 3 : index
    %c0_13 = arith.constant 0 : index
    %c0_14 = arith.constant 0 : index
    %19 = vector.load %arg3[%c3, %c0_13, %c0_14] : memref<9x8x8xf32, #tpu.memory_space<vmem>>, vector<1x8x8xf32>
    %20 = vector.shape_cast %19 : vector<1x8x8xf32> to vector<8x8xf32>
    %21 = vector.extract_strided_slice %2 {offsets = [0, 11], sizes = [8, 256], strides = [1, 1]} : vector<8x512xf32> to vector<8x256xf32>
    %cst_15 = arith.constant dense<0.000000e+00> : vector<8x256xf32>
    %22 = tpu.matmul %20, %21, %cst_15 {dimension_numbers = #tpu.dot_dimension_numbers<[1], [0], [0], [1], [0, 0, 1, 1], [], []>} : vector<8x8xf32>, vector<8x256xf32>, vector<8x256xf32> -> vector<8x256xf32>
    %23 = arith.addf %18, %22 : vector<8x256xf32>
    %c4 = arith.constant 4 : index
    %c0_16 = arith.constant 0 : index
    %c0_17 = arith.constant 0 : index
    %24 = vector.load %arg3[%c4, %c0_16, %c0_17] : memref<9x8x8xf32, #tpu.memory_space<vmem>>, vector<1x8x8xf32>
    %25 = vector.shape_cast %24 : vector<1x8x8xf32> to vector<8x8xf32>
    %26 = vector.extract_strided_slice %2 {offsets = [0, 12], sizes = [8, 256], strides = [1, 1]} : vector<8x512xf32> to vector<8x256xf32>
    %cst_18 = arith.constant dense<0.000000e+00> : vector<8x256xf32>
    %27 = tpu.matmul %25, %26, %cst_18 {dimension_numbers = #tpu.dot_dimension_numbers<[1], [0], [0], [1], [0, 0, 1, 1], [], []>} : vector<8x8xf32>, vector<8x256xf32>, vector<8x256xf32> -> vector<8x256xf32>
    %28 = arith.addf %23, %27 : vector<8x256xf32>
    %c5 = arith.constant 5 : index
    %c0_19 = arith.constant 0 : index
    %c0_20 = arith.constant 0 : index
    %29 = vector.load %arg3[%c5, %c0_19, %c0_20] : memref<9x8x8xf32, #tpu.memory_space<vmem>>, vector<1x8x8xf32>
    %30 = vector.shape_cast %29 : vector<1x8x8xf32> to vector<8x8xf32>
    %31 = vector.extract_strided_slice %2 {offsets = [0, 13], sizes = [8, 256], strides = [1, 1]} : vector<8x512xf32> to vector<8x256xf32>
    %cst_21 = arith.constant dense<0.000000e+00> : vector<8x256xf32>
    %32 = tpu.matmul %30, %31, %cst_21 {dimension_numbers = #tpu.dot_dimension_numbers<[1], [0], [0], [1], [0, 0, 1, 1], [], []>} : vector<8x8xf32>, vector<8x256xf32>, vector<8x256xf32> -> vector<8x256xf32>
    %33 = arith.addf %28, %32 : vector<8x256xf32>
    %c6 = arith.constant 6 : index
    %c0_22 = arith.constant 0 : index
    %c0_23 = arith.constant 0 : index
    %34 = vector.load %arg3[%c6, %c0_22, %c0_23] : memref<9x8x8xf32, #tpu.memory_space<vmem>>, vector<1x8x8xf32>
    %35 = vector.shape_cast %34 : vector<1x8x8xf32> to vector<8x8xf32>
    %36 = vector.extract_strided_slice %2 {offsets = [0, 22], sizes = [8, 256], strides = [1, 1]} : vector<8x512xf32> to vector<8x256xf32>
    %cst_24 = arith.constant dense<0.000000e+00> : vector<8x256xf32>
    %37 = tpu.matmul %35, %36, %cst_24 {dimension_numbers = #tpu.dot_dimension_numbers<[1], [0], [0], [1], [0, 0, 1, 1], [], []>} : vector<8x8xf32>, vector<8x256xf32>, vector<8x256xf32> -> vector<8x256xf32>
    %38 = arith.addf %33, %37 : vector<8x256xf32>
    %c7 = arith.constant 7 : index
    %c0_25 = arith.constant 0 : index
    %c0_26 = arith.constant 0 : index
    %39 = vector.load %arg3[%c7, %c0_25, %c0_26] : memref<9x8x8xf32, #tpu.memory_space<vmem>>, vector<1x8x8xf32>
    %40 = vector.shape_cast %39 : vector<1x8x8xf32> to vector<8x8xf32>
    %41 = vector.extract_strided_slice %2 {offsets = [0, 23], sizes = [8, 256], strides = [1, 1]} : vector<8x512xf32> to vector<8x256xf32>
    %cst_27 = arith.constant dense<0.000000e+00> : vector<8x256xf32>
    %42 = tpu.matmul %40, %41, %cst_27 {dimension_numbers = #tpu.dot_dimension_numbers<[1], [0], [0], [1], [0, 0, 1, 1], [], []>} : vector<8x8xf32>, vector<8x256xf32>, vector<8x256xf32> -> vector<8x256xf32>
    %43 = arith.addf %38, %42 : vector<8x256xf32>
    %c8 = arith.constant 8 : index
    %c0_28 = arith.constant 0 : index
    %c0_29 = arith.constant 0 : index
    %44 = vector.load %arg3[%c8, %c0_28, %c0_29] : memref<9x8x8xf32, #tpu.memory_space<vmem>>, vector<1x8x8xf32>
    %45 = vector.shape_cast %44 : vector<1x8x8xf32> to vector<8x8xf32>
    %46 = vector.extract_strided_slice %2 {offsets = [0, 24], sizes = [8, 256], strides = [1, 1]} : vector<8x512xf32> to vector<8x256xf32>
    %cst_30 = arith.constant dense<0.000000e+00> : vector<8x256xf32>
    %47 = tpu.matmul %45, %46, %cst_30 {dimension_numbers = #tpu.dot_dimension_numbers<[1], [0], [0], [1], [0, 0, 1, 1], [], []>} : vector<8x8xf32>, vector<8x256xf32>, vector<8x256xf32> -> vector<8x256xf32>
    %48 = arith.addf %43, %47 : vector<8x256xf32>
    %c0_31 = arith.constant 0 : index
    %c0_32 = arith.constant 0 : index
    %49 = vector.load %arg5[%c0_31, %c0_32] : memref<8x256xf32, #tpu.memory_space<vmem>>, vector<8x256xf32>
    tpu.vector_store %arg5[%c0_31, %c0_32], %48 {strides = array<i32>} : memref<8x256xf32, #tpu.memory_space<vmem>>, vector<8x256xf32>,
    %c0_33 = arith.constant 0 : index
    %c0_34 = arith.constant 0 : index
    %50 = vector.load %arg4[%c0_33, %c0_34] : memref<1x256xf32, #tpu.memory_space<vmem>>, vector<1x256xf32>
    %51 = vector.shape_cast %50 : vector<1x256xf32> to vector<1x1x256xf32>
    %cst_35 = arith.constant dense<0.000000e+00> : vector<1xf32>
    %52 = vector.multi_reduction <add>, %51, %cst_35 [1, 2] : vector<1x1x256xf32> to vector<1xf32>
    %53 = vector.shape_cast %52 : vector<1xf32> to vector<1x1x1xf32>
    %54 = vector.extract %53[0, 0, 0] : f32 from vector<1x1x1xf32>
    %55 = vector.broadcast %50 : vector<1x256xf32> to vector<8x256xf32>
    %56 = arith.mulf %48, %55 : vector<8x256xf32>
    %cst_36 = arith.constant dense<0.000000e+00> : vector<8xf32>
    %57 = vector.multi_reduction <add>, %56, %cst_36 [1] : vector<8x256xf32> to vector<8xf32>
    %58 = vector.shape_cast %57 : vector<8xf32> to vector<8x1xf32>
    %cst_37 = arith.constant 1.000000e+00 : f32
    %59 = arith.maximumf %54, %cst_37 : f32
    %60 = vector.broadcast %59 : f32 to vector<8x1xf32>
    %61 = arith.divf %58, %60 : vector<8x1xf32>
    %62 = vector.broadcast %61 : vector<8x1xf32> to vector<8x256xf32>
    %63 = arith.subf %48, %62 : vector<8x256xf32>
    %64 = vector.broadcast %50 : vector<1x256xf32> to vector<8x256xf32>
    %65 = arith.mulf %63, %64 : vector<8x256xf32>
    %66 = vector.shape_cast %61 : vector<8x1xf32> to vector<1x8x1xf32>
    %c0_38 = arith.constant 0 : index
    %c0_39 = arith.constant 0 : index
    %c0_40 = arith.constant 0 : index
    %67 = vector.load %arg6[%c0_38, %c0_39, %c0_40] : memref<1x8x1xf32, #tpu.memory_space<vmem>>, vector<1x8x1xf32>
    tpu.vector_store %arg6[%c0_38, %c0_39, %c0_40], %66 {strides = array<i32>} : memref<1x8x1xf32, #tpu.memory_space<vmem>>, vector<1x8x1xf32>,
    %68 = arith.mulf %65, %65 : vector<8x256xf32>
    %cst_41 = arith.constant dense<0.000000e+00> : vector<8xf32>
    %69 = vector.multi_reduction <add>, %68, %cst_41 [1] : vector<8x256xf32> to vector<8xf32>
    %70 = vector.shape_cast %69 : vector<8xf32> to vector<8x1xf32>
    %71 = vector.shape_cast %70 : vector<8x1xf32> to vector<1x8x1xf32>
    %c0_42 = arith.constant 0 : index
    %c0_43 = arith.constant 0 : index
    %c0_44 = arith.constant 0 : index
    %72 = vector.load %arg7[%c0_42, %c0_43, %c0_44] : memref<1x8x1xf32, #tpu.memory_space<vmem>>, vector<1x8x1xf32>
    tpu.vector_store %arg7[%c0_42, %c0_43, %c0_44], %71 {strides = array<i32>} : memref<1x8x1xf32, #tpu.memory_space<vmem>>, vector<1x8x1xf32>,
    return
  }
  func.func @transform_0(%arg0: i32) -> (i32, i32) {
    %c0_i32 = arith.constant 0 : i32
    %c0_i32_0 = arith.constant 0 : i32
    return %c0_i32, %arg0 : i32, i32
  }
  func.func @transform_1(%arg0: i32) -> (i32, i32) {
    %c1_i32 = arith.constant 1 : i32
    %0 = arith.addi %arg0, %c1_i32 : i32
    %c0_i32 = arith.constant 0 : i32
    %c0_i32_0 = arith.constant 0 : i32
    return %c0_i32, %0 : i32, i32
  }
  func.func @transform_2(%arg0: i32) -> (i32, i32, i32) {
    %c0_i32 = arith.constant 0 : i32
    %c0_i32_0 = arith.constant 0 : i32
    %c0_i32_1 = arith.constant 0 : i32
    %c0_i32_2 = arith.constant 0 : i32
    return %c0_i32, %c0_i32_0, %c0_i32_1 : i32, i32, i32
  }
  func.func @transform_3(%arg0: i32) -> (i32, i32) {
    %c0_i32 = arith.constant 0 : i32
    %c0_i32_0 = arith.constant 0 : i32
    return %c0_i32, %arg0 : i32, i32
  }
  func.func @transform_4(%arg0: i32) -> (i32, i32) {
    %c0_i32 = arith.constant 0 : i32
    %c0_i32_0 = arith.constant 0 : i32
    return %c0_i32, %arg0 : i32, i32
  }
  func.func @transform_5(%arg0: i32) -> (i32, i32, i32) {
    %c0_i32 = arith.constant 0 : i32
    %c0_i32_0 = arith.constant 0 : i32
    %c0_i32_1 = arith.constant 0 : i32
    return %arg0, %c0_i32, %c0_i32_0 : i32, i32, i32
  }
  func.func @transform_6(%arg0: i32) -> (i32, i32, i32) {
    %c0_i32 = arith.constant 0 : i32
    %c0_i32_0 = arith.constant 0 : i32
    %c0_i32_1 = arith.constant 0 : i32
    return %arg0, %c0_i32, %c0_i32_0 : i32, i32, i32
  }
}

module attributes {stable_mosaic.version = 11 : i64} {
  func.func @_bn_relu_kernel(%arg0: i32, %arg1: memref<8x256xf32, #tpu.memory_space<vmem>>, %arg2: memref<8x1xf32, #tpu.memory_space<vmem>>, %arg3: memref<8x1xf32, #tpu.memory_space<vmem>>, %arg4: memref<8x256xf32, #tpu.memory_space<vmem>>) attributes {dimension_semantics = [#tpu.dimension_semantics<parallel>], iteration_bounds = array<i64: 2>, scalar_prefetch = 0 : i64, scratch_operands = 0 : i64, tpu.core_type = #tpu.core_type<tc>, window_params = [{transform_indices = @transform_0, window_bounds = array<i64: 8, 256>}, {pipeline_mode = #tpu.pipeline_mode<synchronous>, transform_indices = @transform_1, window_bounds = array<i64: 8, 1>}, {pipeline_mode = #tpu.pipeline_mode<synchronous>, transform_indices = @transform_2, window_bounds = array<i64: 8, 1>}, {transform_indices = @transform_3, window_bounds = array<i64: 8, 256>}]} {
    %c0 = arith.constant 0 : index
    %c0_0 = arith.constant 0 : index
    %0 = vector.load %arg1[%c0, %c0_0] : memref<8x256xf32, #tpu.memory_space<vmem>>, vector<8x256xf32>
    %c0_1 = arith.constant 0 : index
    %c0_2 = arith.constant 0 : index
    %1 = vector.load %arg2[%c0_1, %c0_2] : memref<8x1xf32, #tpu.memory_space<vmem>>, vector<8x1xf32>
    %2 = vector.broadcast %1 : vector<8x1xf32> to vector<8x256xf32>
    %3 = arith.mulf %0, %2 : vector<8x256xf32>
    %c0_3 = arith.constant 0 : index
    %c0_4 = arith.constant 0 : index
    %4 = vector.load %arg3[%c0_3, %c0_4] : memref<8x1xf32, #tpu.memory_space<vmem>>, vector<8x1xf32>
    %5 = vector.broadcast %4 : vector<8x1xf32> to vector<8x256xf32>
    %6 = arith.addf %3, %5 : vector<8x256xf32>
    %cst = arith.constant 0.000000e+00 : f32
    %7 = vector.broadcast %cst : f32 to vector<8x256xf32>
    %8 = arith.maximumf %6, %7 : vector<8x256xf32>
    %c0_5 = arith.constant 0 : index
    %c0_6 = arith.constant 0 : index
    %9 = vector.load %arg4[%c0_5, %c0_6] : memref<8x256xf32, #tpu.memory_space<vmem>>, vector<8x256xf32>
    tpu.vector_store %arg4[%c0_5, %c0_6], %8 {strides = array<i32>} : memref<8x256xf32, #tpu.memory_space<vmem>>, vector<8x256xf32>,
    return
  }
  func.func @transform_0(%arg0: i32) -> (i32, i32) {
    %c0_i32 = arith.constant 0 : i32
    %c0_i32_0 = arith.constant 0 : i32
    return %c0_i32, %arg0 : i32, i32
  }
  func.func @transform_1(%arg0: i32) -> (i32, i32) {
    %c0_i32 = arith.constant 0 : i32
    %c0_i32_0 = arith.constant 0 : i32
    %c0_i32_1 = arith.constant 0 : i32
    return %c0_i32, %c0_i32_0 : i32, i32
  }
  func.func @transform_2(%arg0: i32) -> (i32, i32) {
    %c0_i32 = arith.constant 0 : i32
    %c0_i32_0 = arith.constant 0 : i32
    %c0_i32_1 = arith.constant 0 : i32
    return %c0_i32, %c0_i32_0 : i32, i32
  }
  func.func @transform_3(%arg0: i32) -> (i32, i32) {
    %c0_i32 = arith.constant 0 : i32
    %c0_i32_0 = arith.constant 0 : i32
    return %c0_i32, %arg0 : i32, i32
  }
}

</mosaic_0001>

<bundles_post_ra>
// kernel: fourier_convolution.3
= control target key start
LH: loop header
LB: loop body
LE: loop exit
PB: predicated region body
PF: predicated region fallthrough
CT: control target
= control target key end

     0   :  { %s302_s12 = smov 0   ;;  %s325_s0 = inlined_call_operand.vmem [shape: f32[8,512], index: 0, kind: input, shape index: {}, may-alias: {0,3}]   ;;  %s326_s1 = inlined_call_operand.vmem [shape: f32[8,1], index: 1, kind: input, shape index: {}]   ;;  %s327_s2 = inlined_call_operand.vmem [shape: f32[8,1], index: 2, kind: input, shape index: {}]   ;;  %s328_s3 = inlined_call_operand.vmem [shape: f32[8,512], index: 3, kind: output, shape index: {}, may-alias: {0,3}]  }
   0x1 LB: > { %s252_s13 = sadd.s32 4294967295, %s279_s12   ;;  %p256_p0 = scmp.ge.s32.totalorder %s279_s12, 1  ;;  %s279_s12 = sphi %s302_s12, %s13_s12  }
   0x2   : > { %p138_p1 = scmp.lt.s32.totalorder %s279_s12, 3 }
   0x4   : > { %p139_p2 = pnand %p256_p0, %p138_p1 }
   0x5   : > { %s257_s18 = sshll.u32 (!%p139_p2), %s252_s13, 1 }
   0x6   : > { %142 = sbr.rel (%p139_p2) target bundleno = 142 (0x8e), region = 32  ;;  %p163_p3 = scmp.lt.s32.totalorder (!%p139_p2), %s257_s18, 3 }
   0xb   : > { %v176_v0 = vld [vmem:[%s326_s1] sm:$0xff]  ;;  %v281_v1 = vmov 0   ;;  %s330_s18 = smov (!%p163_p3, %s257_s18), 3 }
   0xc   : > { %272 = vset.pattern.permute.xlu0 %v281_v1  ;;  %v184_v2 = vld [vmem:[%s327_s2] sm:$0xff]  ;;  %s258_s19 = sshll.u32 %s330_s18, 3 }
   0xd   : > { %179 = vperm.xlu0 %272, %v176_v0   ;;  %s166_s22 = scalar_lea.vmem %s325_s0, %s258_s19  ;;  %s172_s25 = scalar_lea.vmem %s328_s3, %s258_s19 }
   0xe   : > { %v174_v4 = vld [vmem:[%s166_s22] sm:$0xff]  ;;  %v175_v5 = vld [vmem:[%s166_s22 + $0x8] sm:$0xff] }
  0x15   : > { %187 = vperm.xlu0 %272, %v184_v2  }
  0x7f   : > { %v180_v3 = vpop.permute.xlu0 %179 }
  0x80   : > { %v182_v6 = vmul.f32 %v180_v3, %v174_v4  ;;  %v183_v7 = vmul.f32 %v180_v3, %v175_v5 }
  0x87   : > { %v188_v8 = vpop.permute.xlu0 %187 }
  0x88   : > { %v190_v9 = vadd.f32 %v188_v8, %v182_v6  ;;  %v191_v10 = vadd.f32 %v188_v8, %v183_v7 }
  0x8a   : > { %v192_v11 = vmax.f32 %v190_v9, 0.0  ;;  %v193_v12 = vmax.f32 %v191_v10, 0.0 }
  0x8c   : > { %194 = vst [vmem:[%s172_s25] sm:$0xff] %v192_v11 }
  0x8d   : > { %195 = vst [vmem:[%s172_s25 + $0x8] sm:$0xff] %v193_v12 }
  0x8e PF: > { %s13_s12 = sadd.s32 1, %s279_s12  }
  0x8f   : > { %p10_p4 = scmp.ge.s32.totalorder %s13_s12, 4  }
  0x91   :  { %12 = sbr.rel (!%p10_p4) target bundleno = 1 (0x1), region = 62 }

// kernel: fourier_convolution.2
= control target key start
LH: loop header
LB: loop body
LE: loop exit
PB: predicated region body
PF: predicated region fallthrough
CT: control target
= control target key end

     0   :  { %s1188_s21 = smov 0   ;;  %s1304_s0 = inlined_call_operand.vmem [shape: f32[8,768], index: 0, kind: input, shape index: {}, may-alias: {0,1}]   ;;  %s1305_s1 = inlined_call_operand.vmem [shape: f32[8,768], index: 1, kind: input, shape index: {}, may-alias: {0,1}]   ;;  %s1306_s2 = inlined_call_operand.vmem [shape: f32[9,8,8], index: 2, kind: input, shape index: {}]   ;;  %s1307_s3 = inlined_call_operand.vmem [shape: f32[1,512], index: 3, kind: input, shape index: {}]   ;;  %s1308_s4 = inlined_call_operand.vmem [shape: f32[8,512], index: 4, kind: output, shape index: {0}]   ;;  %s1309_s5 = inlined_call_operand.vmem [shape: f32[2,8,1], index: 5, kind: output, shape index: {1}]   ;;  %s1310_s6 = inlined_call_operand.vmem [shape: f32[2,8,1], index: 6, kind: output, shape index: {2}]  }
   0x1 LB: > { %s1194_s22 = sadd.s32 4294967295, %s1142_s21   ;;  %p1035_p0 = scmp.ge.s32.totalorder %s1142_s21, 1  ;;  %s1142_s21 = sphi %s1188_s21, %s17_s21  }
   0x2   : > { %p243_p1 = scmp.lt.s32.totalorder %s1142_s21, 3 }
   0x4   : > { %p244_p2 = pnand %p1035_p0, %p243_p1 }
   0x5   : > { %s1199_s23 = sshll.u32 (!%p244_p2), %s1194_s22, 1  ;;  %s1144_s7 = smov (!%p244_p2), 126  }
   0x6   : > { %247 = sbr.rel (%p244_p2) target bundleno = 552 (0x228), region = 36  ;;  %p292_p3 = scmp.lt.s32.totalorder (!%p244_p2), %s1199_s23, 5 }
   0x7   : > { %s1074_s24 = sadd.s32 (!%p244_p2), 2, %s1199_s23  ;;  %s1145_s8 = smov (!%p244_p2), 127  }
   0x8   : > { %p299_p4 = scmp.lt.s32.totalorder (!%p244_p2), %s1074_s24, 5  ;;  %s1146_s9 = smov (!%p244_p2), 117  }
   0x9   : > { %s1147_s13 = smov (!%p244_p2), 116   ;;  %s1148_s14 = smov (!%p244_p2), 115  }
   0xa   : > { %s1149_s15 = smov (!%p244_p2), 106   ;;  %s1150_s16 = smov (!%p244_p2), 105  }
   0xb   : > { %s293_s25 = scalar_select %p292_p3, %s1199_s23, 5  ;;  %vm344_vm0 = vcmask 64512   ;;  %v327_v4 = vld [vmem:[%s1306_s2] sm:$0xff]  ;;  %vm497_vm1 = vcmask 957440   ;;  %v1053_v8 = vld [vmem:[%s1306_s2 + $0x18] sm:$0xff]  ;;  %vm613_vm2 = vcmask 941056  }
   0xc   : > { %s1312_s24 = smov (!%p299_p4, %s1074_s24), 5  ;;  %s1151_s17 = smov 104   ;;  %v1227_v15 = vld [vmem:[%s1306_s2 + $0x28] sm:$0xff]  ;;  %vm339_vm3 = vcmask 1039360   ;;  %vm439_vm4 = vcmask 1031168   ;;  %v1050_v30 = vld [vmem:[%s1306_s2 + $0x10] sm:$0xff] }
   0xd   : > { %s1037_s26 = sshll.u32 %s293_s25, 3  ;;  %s1039_s30 = sshll.u32 %s1312_s24, 3  ;;  %v1045_v23 = vld [vmem:[%s1306_s2 + $0x8] sm:$0xff]  ;;  %vm845_vm5 = vcmask 1040384   ;;  %vm555_vm6 = vcmask 949248   ;;  %v1056_v42 = vld [vmem:[%s1306_s2 + $0x20] sm:$0xff] }
   0xe   : > { %s295_s29 = scalar_lea.vmem %s1304_s0, %s1037_s26  ;;  %s302_s12 = scalar_lea.vmem %s1305_s1, %s1039_s30  ;;  %vm671_vm7 = vcmask 867328   ;;  %vm787_vm8 = vcmask 850944   ;;  %v1062_v53 = vld [vmem:[%s1306_s2 + $0x30] sm:$0xff]  ;;  %vm729_vm9 = vcmask 859136   ;;  %v1065_v61 = vld [vmem:[%s1306_s2 + $0x38] sm:$0xff]  ;;  %vm884_vm14 = vcmask 7168  }
   0xf   : > { %v324_v0 = vld [vmem:[%s295_s29] sm:$0xff]  ;;  %v325_v1 = vld [vmem:[%s295_s29 + $0x8] sm:$0xff]  ;;  %p306_p5 = scmp.lt.s32.totalorder %s1199_s23, 3  ;;  %s1152_s25 = smov 1.0  }
  0x10   : > { %v1099_v2 = vpack.i.bf16 %v325_v1, %v324_v0  ;;  %406 = vmatpush.msra.mxu2 %v324_v0  ;;  %426 = vmatpush.msra.mxu3 %v325_v1  ;;  %v326_v3 = vld [vmem:[%s302_s12] sm:$0xff]  ;;  %p316_p6 = scmp.lt.s32.totalorder %s1194_s22, 1 }
  0x11   : > { %1048 = vmatmul.msk.f32.vlgmr.msra.gmra.mxu2 %vm344_vm0, %v327_v4  ;;  %1049 = vmatmul.msk.f32.vlgmr.msra.gmra.mxu3 %vm344_vm0, %v327_v4  ;;  %s1314_s23 = smov (!%p306_p5, %s1199_s23), 3  ;;  %v1068_v0 = vld [vmem:[%s1306_s2 + $0x40] sm:$0xff] }
  0x12   : > { %1100 = vrot.lane.b32.xlu1 %v1099_v2, %s1144_s7  ;;  %1095 = vrot.lane.b32.xlu0 %v1099_v2, %s1145_s8  ;;  %s1042_s18 = sshll.u32 %s1314_s23, 3  ;;  %s1316_s22 = smov (!%p316_p6, %s1194_s22), 1 }
  0x13   : > { %1105 = vrot.lane.b32.xlu2 %v1099_v2, %s1146_s9  ;;  %s314_s24 = scalar_lea.vmem %s1308_s4, %s1042_s18  ;;  %s1043_s27 = sshll.u32 %s1316_s22, 3 }
  0x14   : > { %s319_s30 = scalar_lea.vmem %s1309_s5, %s1043_s27 }
  0x1a   : > { %437 = vrot.lane.b32.xlu1 %v326_v3, %s1144_s7  ;;  %337 = vrot.lane.b32.xlu0 %v326_v3, %s1145_s8  ;;  %s308_s7 = scalar_lea.vmem %s1307_s3, %s1314_s23  ;;  %s323_s8 = scalar_lea.vmem %s1310_s6, %s1043_s27 }
  0x1b   : > { %495 = vrot.lane.b32.xlu2 %v326_v3, %s1146_s9  ;;  %v839_v31 = vld [vmem:[%s308_s7] sm:$0x3] }
  0x1c   : > { %v1252_v33 = vperm.slane %v839_v31, 0  ;;  %v1254_v34 = vperm.slane %v839_v31, 1 }
  0x1e   : > { %v846_v35 = vsel %vm845_vm5, %v1252_v33, 0.0  ;;  %v847_v36 = vsel %vm845_vm5, %v1254_v34, 0.0 }
  0x1f   : > { %v848_v37 = vadd.f32 %v847_v36, %v846_v35 }
  0x22   : > { %1110 = vrot.lane.b32.xlu0 %v1099_v2, %s1147_s13  ;;  %553 = vrot.lane.b32.xlu1 %v326_v3, %s1147_s13 }
  0x23   : > { %1115 = vrot.lane.b32.xlu2 %v1099_v2, %s1148_s14 }
  0x2a   : > { %611 = vrot.lane.b32.xlu0 %v326_v3, %s1148_s14  ;;  %1120 = vrot.lane.b32.xlu1 %v1099_v2, %s1149_s15 }
  0x2b   : > { %669 = vrot.lane.b32.xlu2 %v326_v3, %s1149_s15 }
  0x32   : > { %1125 = vrot.lane.b32.xlu0 %v1099_v2, %s1150_s16  ;;  %727 = vrot.lane.b32.xlu1 %v326_v3, %s1150_s16 }
  0x33   : > { %1130 = vrot.lane.b32.xlu2 %v1099_v2, %s1151_s17 }
  0x3a   : > { %785 = vrot.lane.b32.xlu0 %v326_v3, %s1151_s17 }
  0x5c   : > { %849 = vadd.xlane.f32.xlu1 %v848_v37 }
  0x6d   : > { %v1106_v5 = vpop.permute.xlu2 %1105 }
  0x6e   : > { %v1108_v6 = vunpack.i.h.bf16 %v1106_v5  ;;  %v1107_v7 = vunpack.i.l.bf16 %v1106_v5 }
  0x70   : > { %v498_v9 = vsel %vm497_vm1, %v1107_v7, %v1108_v6 }
  0x71   : > { %520 = vmatpush.msrb.mxu2 %v498_v9 }
  0x72   : > { %1054 = vmatmul.msk.f32.vlgmr.msrb.gmra.mxu2 %vm344_vm0, %v1053_v8 }
  0x75   : > { %v496_v10 = vpop.permute.xlu2 %495 }
  0x76   : > { %v499_v11 = vsel %vm497_vm1, %v1108_v6, %v496_v10 }
  0x77   : > { %540 = vmatpush.msrb.mxu3 %v499_v11 }
  0x78   : > { %1055 = vmatmul.msk.f32.vlgmr.msrb.gmra.mxu3 %vm344_vm0, %v1053_v8 }
  0x7d   : > { %v1220_v12 = vpop.permute.xlu2 %1115 }
  0x7e   : > { %v1118_v13 = vunpack.i.h.bf16 %v1220_v12  ;;  %v1117_v14 = vunpack.i.l.bf16 %v1220_v12 }
  0x80   : > { %v614_v16 = vsel %vm613_vm2, %v1117_v14, %v1118_v13 }
  0x81   : > { %636 = vmatpush.msra.mxu2 %v614_v16 }
  0x82   : > { %1060 = vmatmul.msk.f32.vlgmr.msra.gmra.mxu2 %vm344_vm0, %v1227_v15 }
  0x84   : > { %v1101_v17 = vpop.permute.xlu1 %1100  ;;  %v1096_v18 = vpop.permute.xlu0 %1095 }
  0x85   : > { %v1103_v19 = vunpack.i.h.bf16 %v1101_v17  ;;  %v1102_v20 = vunpack.i.l.bf16 %v1101_v17  ;;  %v1098_v21 = vunpack.i.h.bf16 %v1096_v18  ;;  %v1097_v22 = vunpack.i.l.bf16 %v1096_v18  ;;  %v670_v32 = vpop.permute.xlu2 %669 }
  0x87   : > { %v340_v24 = vsel %vm339_vm3, %v1097_v22, %v1098_v21  ;;  %v440_v25 = vsel %vm439_vm4, %v1102_v20, %v1103_v19 }
  0x88   : > { %363 = vmatpush.msra.mxu0 %v340_v24 }
  0x89   : > { %1046 = vmatmul.msk.f32.vlgmr.msra.gmra.mxu0 %vm344_vm0, %v1045_v23 }
  0x8a   : > { %462 = vmatpush.msrb.mxu0 %v440_v25 }
  0x8c   : > { %v438_v26 = vpop.permute.xlu1 %437  ;;  %v338_v27 = vpop.permute.xlu0 %337 }
  0x8d   : > { %v341_v28 = vsel %vm339_vm3, %v1098_v21, %v338_v27  ;;  %v441_v29 = vsel %vm439_vm4, %v1103_v19, %v438_v26  ;;  %v1131_v45 = vpop.permute.xlu2 %1130 }
  0x8e   : > { %383 = vmatpush.msra.mxu1 %v341_v28  ;;  %v1133_v46 = vunpack.i.h.bf16 %v1131_v45  ;;  %v1132_v47 = vunpack.i.l.bf16 %v1131_v45 }
  0x8f   : > { %1047 = vmatmul.msk.f32.vlgmr.msra.gmra.mxu1 %vm344_vm0, %v1045_v23 }
  0x90   : > { %482 = vmatpush.msrb.mxu1 %v441_v29  ;;  %v788_v56 = vsel %vm787_vm8, %v1132_v47, %v1133_v46 }
  0x91   : > { %1051 = vmatmul.msk.f32.vlgmr.msrb.gmra.mxu0 %vm344_vm0, %v1050_v30 }
  0x94   : > { %v1111_v38 = vpop.permute.xlu0 %1110  ;;  %v554_v39 = vpop.permute.xlu1 %553 }
  0x95   : > { %v1113_v40 = vunpack.i.h.bf16 %v1111_v38  ;;  %v1112_v41 = vunpack.i.l.bf16 %v1111_v38  ;;  %v408_v6 = vpop.f32.mrf.mxu2  ;;  %v428_v7 = vpop.f32.mrf.mxu3 }
  0x97   : > { %v557_v43 = vsel %vm555_vm6, %v1113_v40, %v554_v39  ;;  %1052 = vmatmul.msk.f32.vlgmr.msrb.gmra.mxu1 %vm344_vm0, %v1050_v30  ;;  %v556_v44 = vsel %vm555_vm6, %v1112_v41, %v1113_v40 }
  0x98   : > { %578 = vmatpush.msra.mxu0 %v556_v44  ;;  %598 = vmatpush.msra.mxu1 %v557_v43 }
  0x99   : > { %1057 = vmatmul.msk.f32.vlgmr.msra.gmra.mxu0 %vm344_vm0, %v1056_v42 }
  0x9c   : > { %v612_v48 = vpop.permute.xlu0 %611  ;;  %v1121_v49 = vpop.permute.xlu1 %1120 }
  0x9d   : > { %v615_v50 = vsel %vm613_vm2, %v1118_v13, %v612_v48  ;;  %v1123_v51 = vunpack.i.h.bf16 %v1121_v49  ;;  %v1122_v52 = vunpack.i.l.bf16 %v1121_v49 }
  0x9e   : > { %656 = vmatpush.msra.mxu3 %v615_v50 }
  0x9f   : > { %1058 = vmatmul.msk.f32.vlgmr.msra.gmra.mxu1 %vm344_vm0, %v1056_v42  ;;  %1061 = vmatmul.msk.f32.vlgmr.msra.gmra.mxu3 %vm344_vm0, %v1227_v15  ;;  %v673_v54 = vsel %vm671_vm7, %v1123_v51, %v670_v32  ;;  %v672_v55 = vsel %vm671_vm7, %v1122_v52, %v1123_v51 }
  0xa0   : > { %694 = vmatpush.msrb.mxu0 %v672_v55  ;;  %714 = vmatpush.msrb.mxu1 %v673_v54 }
  0xa1   : > { %1063 = vmatmul.msk.f32.vlgmr.msrb.gmra.mxu0 %vm344_vm0, %v1062_v53 }
  0xa2   : > { %810 = vmatpush.msra.mxu0 %v788_v56 }
  0xa4   : > { %v1126_v57 = vpop.permute.xlu0 %1125  ;;  %v728_v58 = vpop.permute.xlu1 %727 }
  0xa5   : > { %v1128_v59 = vunpack.i.h.bf16 %v1126_v57  ;;  %v1127_v60 = vunpack.i.l.bf16 %v1126_v57 }
  0xa7   : > { %v731_v62 = vsel %vm729_vm9, %v1128_v59, %v728_v58  ;;  %1064 = vmatmul.msk.f32.vlgmr.msrb.gmra.mxu1 %vm344_vm0, %v1062_v53  ;;  %v730_v63 = vsel %vm729_vm9, %v1127_v60, %v1128_v59 }
  0xa8   : > { %752 = vmatpush.msrb.mxu2 %v730_v63  ;;  %772 = vmatpush.msrb.mxu3 %v731_v62 }
  0xa9   : > { %1066 = vmatmul.msk.f32.vlgmr.msrb.gmra.mxu2 %vm344_vm0, %v1065_v61  ;;  %1067 = vmatmul.msk.f32.vlgmr.msrb.gmra.mxu3 %vm344_vm0, %v1065_v61 }
  0xaa   : > { %1069 = vmatmul.msk.f32.vlgmr.msra.gmra.mxu0 %vm344_vm0, %v1068_v0 }
  0xac   : > { %v786_v1 = vpop.permute.xlu0 %785 }
  0xad   : > { %v789_v2 = vsel %vm787_vm8, %v1133_v46, %v786_v1 }
  0xae   : > { %830 = vmatpush.msra.mxu1 %v789_v2 }
  0xaf   : > { %1070 = vmatmul.msk.f32.vlgmr.msra.gmra.mxu1 %vm344_vm0, %v1068_v0 }
  0xcf   : > { %v850_v9 = vpop.xlane.xlu1 %849 }
  0xd0   : > { %v851_v10 = vrot.slane %v850_v9, 4 }
  0xd2   : > { %v852_v11 = vadd.f32 %v851_v10, %v850_v9 }
  0xd4   : > { %v853_v14 = vrot.slane %v852_v11, 2 }
  0xd6   : > { %v854_v18 = vadd.f32 %v853_v14, %v852_v11 }
  0xd8   : > { %v855_v20 = vrot.slane %v854_v18, 1 }
  0xda   : > { %v856_v23 = vadd.f32 %v855_v20, %v854_v18 }
  0xdc   : > { %1075 = vpush %v856_v23 }
  0xf5   : > { %v522_v13 = vpop.f32.mrf.mxu2 }
  0xfb   : > { %v542_v16 = vpop.f32.mrf.mxu3 }
 0x105   : > { %v638_v27 = vpop.f32.mrf.mxu2 }
 0x106   : > { %v365_v3 = vpop.f32.mrf.mxu0 }
 0x107   : > { %v409_v15 = vadd.f32 %v408_v6, %v365_v3 }
 0x10c   : > { %v385_v4 = vpop.f32.mrf.mxu1 }
 0x10d   : > { %v429_v19 = vadd.f32 %v428_v7, %v385_v4  ;;  %s1076_s23 = spop %1075 }
 0x10e   : > { %v464_v5 = vpop.f32.mrf.mxu0  ;;  %s863_s26 = smax.f32 %s1152_s25, %s1076_s23 }
 0x10f   : > { %v487_v21 = vadd.f32 %v464_v5, %v409_v15  ;;  %v864_v49 = vstv %s863_s26 }
 0x110   : > { %1134 = vrcp.f32 %v864_v49  ;;  %vm870_vm10 = vweird.f32 %v864_v49  ;;  %v876_v54 = vand.u32 2147483648, %v864_v49  ;;  %v874_v56 = vand.u32 2147483647, %v864_v49 }
 0x111   : > { %v545_v24 = vadd.f32 %v522_v13, %v487_v21 }
 0x112   : > { %v877_v57 = vor.u32 1.1754944e-38, %v876_v54  ;;  %vm875_vm13 = vcmp.eq.f32.partialorder %v874_v56, 8.507059e+37 }
 0x114   : > { %v484_v8 = vpop.f32.mrf.mxu1 }
 0x115   : > { %v488_v22 = vadd.f32 %v484_v8, %v429_v19 }
 0x116   : > { %v580_v12 = vpop.f32.mrf.mxu0  ;;  %v1135_v50 = vpop.eup %1134 }
 0x117   : > { %v546_v25 = vadd.f32 %v542_v16, %v488_v22  ;;  %v603_v29 = vadd.f32 %v580_v12, %v545_v24  ;;  %v866_v51 = vmul.f32 %v1135_v50, %v864_v49  ;;  %vm871_vm11 = vweird.f32 %v1135_v50 }
 0x118   : > { %vm872_vm12 = vmor %vm870_vm10, %vm871_vm11 }
 0x119   : > { %v661_v35 = vadd.f32 %v638_v27, %v603_v29  ;;  %v867_v52 = vsub.f32 1.0, %v866_v51 }
 0x11b   : > { %v868_v53 = vmul.f32 %v1135_v50, %v867_v52 }
 0x11c   : > { %v600_v17 = vpop.f32.mrf.mxu1 }
 0x11d   : > { %v604_v30 = vadd.f32 %v600_v17, %v546_v25  ;;  %v869_v55 = vadd.f32 %v1135_v50, %v868_v53 }
 0x11e   : > { %v696_v26 = vpop.f32.mrf.mxu0 }
 0x11f   : > { %v719_v36 = vadd.f32 %v696_v26, %v661_v35  ;;  %v873_v58 = vsel %vm872_vm12, %v1135_v50, %v869_v55 }
 0x120   : > { %v878_v59 = vsel %vm875_vm13, %v877_v57, %v873_v58 }
 0x122   : > { %v658_v28 = vpop.f32.mrf.mxu3 }
 0x123   : > { %v662_v32 = vadd.f32 %v658_v28, %v604_v30 }
 0x124   : > { %v716_v31 = vpop.f32.mrf.mxu1 }
 0x125   : > { %v720_v37 = vadd.f32 %v716_v31, %v662_v32 }
 0x127   : > { %v812_v38 = vpop.f32.mrf.mxu0 }
 0x12c   : > { %v754_v39 = vpop.f32.mrf.mxu2  ;;  %v774_v40 = vpop.f32.mrf.mxu3 }
 0x12d   : > { %v777_v41 = vadd.f32 %v754_v39, %v719_v36  ;;  %v778_v42 = vadd.f32 %v774_v40, %v720_v37  ;;  %v832_v43 = vpop.f32.mrf.mxu1 }
 0x12f   : > { %v835_v44 = vadd.f32 %v812_v38, %v777_v41  ;;  %v836_v45 = vadd.f32 %v832_v43, %v778_v42 }
 0x131   : > { %837 = vst [vmem:[%s314_s24] sm:$0xff] %v835_v44  ;;  %v858_v46 = vmul.f32 %v1252_v33, %v835_v44  ;;  %v859_v47 = vmul.f32 %v1254_v34, %v836_v45 }
 0x132   : > { %838 = vst [vmem:[%s314_s24 + $0x8] sm:$0xff] %v836_v45 }
 0x133   : > { %v860_v48 = vadd.f32 %v859_v47, %v858_v46 }
 0x135   : > { %861 = vadd.xlane.f32.xlu2 %v860_v48 }
 0x1a8   : > { %v862_v60 = vpop.xlane.xlu2 %861 }
 0x1a9   : > { %v879_v61 = vmul.f32 %v878_v59, %v862_v60 }
 0x1ab   : > { %v880_v62 = vsub.f32 %v835_v44, %v879_v61  ;;  %v881_v63 = vsub.f32 %v836_v45, %v879_v61  ;;  %885 = vst.msk [vmem:[%s319_s30] sm:$0xff] %vm884_vm14, %v879_v61 }
 0x1ad   : > { %v882_v0 = vmul.f32 %v880_v62, %v1252_v33  ;;  %v883_v1 = vmul.f32 %v881_v63, %v1254_v34 }
 0x1af   : > { %v886_v2 = vmul.f32 %v882_v0, %v882_v0  ;;  %v887_v3 = vmul.f32 %v883_v1, %v883_v1 }
 0x1b1   : > { %v888_v4 = vadd.f32 %v887_v3, %v886_v2 }
 0x1b3   : > { %889 = vadd.xlane.f32.xlu0 %v888_v4 }
 0x226   : > { %v890_v5 = vpop.xlane.xlu0 %889 }
 0x227   : > { %891 = vst.msk [vmem:[%s323_s8] sm:$0xff] %vm884_vm14, %v890_v5 }
 0x228 PF: > { %s17_s21 = sadd.s32 1, %s1142_s21  }
 0x229   : > { %p14_p7 = scmp.ge.s32.totalorder %s17_s21, 4  }
 0x22b   :  { %16 = sbr.rel (!%p14_p7) target bundleno = 1 (0x1), region = 104 }

// kernel: reverse.0
= control target key start
LH: loop header
LB: loop body
LE: loop exit
PB: predicated region body
PF: predicated region fallthrough
CT: control target
= control target key end

     0   :  { %v72_v3 = vlaneseq  ;;  %v65_v6 = vld [vmem:[#allocation0 + $0x7] ss:$-1 sm:$0xff]  ;;  %v79_v8 = vld [vmem:[#allocation0 + $0x17] ss:$-1 sm:$0xff]  ;;  %s331_s0 = inlined_call_operand.vmem [shape: f32[2,4,16,7], index: 0, kind: input, shape index: {}]   ;;  %s332_s1 = inlined_call_operand.vmem [shape: f32[2,4,16,7], index: 1, kind: output, shape index: {}]  }
   0x1   :  { %v45_v0 = vld [vmem:[%s331_s0] sm:$0xff]  ;;  %v47_v1 = vld [vmem:[%s331_s0 + $0x8] sm:$0xff]  ;;  %v49_v2 = vld [vmem:[%s331_s0 + $0x10] sm:$0xff]  ;;  %v66_v12 = vrot.slane %v65_v6, 1  ;;  %v80_v13 = vrot.slane %v79_v8, 1 }
   0x2   :  { %46 = vst [vmem:[#allocation0 + $0x8] sm:$0xff] %v45_v0  ;;  %v51_v4 = vld [vmem:[%s331_s0 + $0x18] sm:$0xff]  ;;  %v53_v5 = vld [vmem:[%s331_s0 + $0x20] sm:$0xff]  ;;  %v55_v7 = vld [vmem:[%s331_s0 + $0x28] sm:$0xff]  ;;  %v73_v10 = vshrl.u32 %v72_v3, 7 }
   0x3   :  { %48 = vst [vmem:[#allocation0 + $0x18] sm:$0xff] %v47_v1  ;;  %v57_v9 = vld [vmem:[%s331_s0 + $0x30] sm:$0xff]  ;;  %v59_v11 = vld [vmem:[%s331_s0 + $0x38] sm:$0xff]  ;;  %v93_v14 = vld [vmem:[#allocation0 + $0x27] ss:$-1 sm:$0xff] }
   0x4   :  { %50 = vst [vmem:[#allocation0 + $0x28] sm:$0xff] %v49_v2  ;;  %vm74_vm0 = vcmp.lt.s32.totalorder %v73_v10, 7  ;;  %v107_v16 = vld [vmem:[#allocation0 + $0x37] ss:$-1 sm:$0xff]  ;;  %v94_v19 = vrot.slane %v93_v14, 1 }
   0x5   :  { %52 = vst [vmem:[#allocation0 + $0x38] sm:$0xff] %v51_v4  ;;  %v121_v22 = vld [vmem:[#allocation0 + $0x47] ss:$-1 sm:$0xff]  ;;  %v108_v24 = vrot.slane %v107_v16, 1  ;;  %v135_v28 = vld [vmem:[#allocation0 + $0x57] ss:$-1 sm:$0xff] }
   0x6   :  { %54 = vst [vmem:[#allocation0 + $0x48] sm:$0xff] %v53_v5  ;;  %v122_v29 = vrot.slane %v121_v22, 1  ;;  %v149_v32 = vld [vmem:[#allocation0 + $0x67] ss:$-1 sm:$0xff]  ;;  %v136_v33 = vrot.slane %v135_v28, 1 }
   0x7   :  { %56 = vst [vmem:[#allocation0 + $0x58] sm:$0xff] %v55_v7  ;;  %v163_v36 = vld [vmem:[#allocation0 + $0x77] ss:$-1 sm:$0xff]  ;;  %v150_v37 = vrot.slane %v149_v32, 1 }
   0x8   :  { %58 = vst [vmem:[#allocation0 + $0x68] sm:$0xff] %v57_v9  ;;  %v164_v40 = vrot.slane %v163_v36, 1 }
   0x9   :  { %60 = vst [vmem:[#allocation0 + $0x78] sm:$0xff] %v59_v11  ;;  %v70_v15 = vld [vmem:[#allocation0 + $0xf] ss:$-1 sm:$0xff] }
   0xa   :  { %67 = vst [vmem:[#allocation1] sm:$0xff] %v66_v12  ;;  %v71_v17 = vrot.slane %v70_v15, 1  ;;  %v84_v18 = vld [vmem:[#allocation0 + $0x1f] ss:$-1 sm:$0xff] }
   0xb   :  { %81 = vst [vmem:[#allocation1 + $0x8] sm:$0xff] %v80_v13  ;;  %v85_v20 = vrot.slane %v84_v18, 1  ;;  %v98_v21 = vld [vmem:[#allocation0 + $0x2f] ss:$-1 sm:$0xff] }
   0xc   :  { %75 = vst.msk [vmem:[#allocation1] sm:$0xff] %vm74_vm0, %v71_v17  ;;  %v99_v23 = vrot.slane %v98_v21, 1  ;;  %v112_v25 = vld [vmem:[#allocation0 + $0x3f] ss:$-1 sm:$0xff] }
   0xd   :  { %89 = vst.msk [vmem:[#allocation1 + $0x8] sm:$0xff] %vm74_vm0, %v85_v20  ;;  %v113_v26 = vrot.slane %v112_v25, 1  ;;  %v126_v27 = vld [vmem:[#allocation0 + $0x4f] ss:$-1 sm:$0xff] }
   0xe   :  { %95 = vst [vmem:[#allocation1 + $0x10] sm:$0xff] %v94_v19  ;;  %v140_v30 = vld [vmem:[#allocation0 + $0x5f] ss:$-1 sm:$0xff]  ;;  %v127_v31 = vrot.slane %v126_v27, 1 }
   0xf   :  { %103 = vst.msk [vmem:[#allocation1 + $0x10] sm:$0xff] %vm74_vm0, %v99_v23  ;;  %v154_v34 = vld [vmem:[#allocation0 + $0x6f] ss:$-1 sm:$0xff]  ;;  %v141_v35 = vrot.slane %v140_v30, 1 }
  0x10   :  { %109 = vst [vmem:[#allocation1 + $0x18] sm:$0xff] %v108_v24  ;;  %v168_v38 = vld [vmem:[#allocation0 + $0x7f] ss:$-1 sm:$0xff]  ;;  %v155_v39 = vrot.slane %v154_v34, 1 }
  0x11   :  { %117 = vst.msk [vmem:[#allocation1 + $0x18] sm:$0xff] %vm74_vm0, %v113_v26  ;;  %v169_v41 = vrot.slane %v168_v38, 1 }
  0x12   :  { %123 = vst [vmem:[#allocation1 + $0x20] sm:$0xff] %v122_v29 }
  0x13   :  { %131 = vst.msk [vmem:[#allocation1 + $0x20] sm:$0xff] %vm74_vm0, %v127_v31  ;;  %v216_v42 = vld [vmem:[#allocation1] sm:$0xff] }
  0x14   :  { %137 = vst [vmem:[#allocation1 + $0x28] sm:$0xff] %v136_v33  ;;  %v218_v43 = vld [vmem:[#allocation1 + $0x8] sm:$0xff] }
  0x15   :  { %145 = vst.msk [vmem:[#allocation1 + $0x28] sm:$0xff] %vm74_vm0, %v141_v35 }
  0x16   :  { %151 = vst [vmem:[#allocation1 + $0x30] sm:$0xff] %v150_v37  ;;  %v220_v44 = vld [vmem:[#allocation1 + $0x10] sm:$0xff] }
  0x17   :  { %159 = vst.msk [vmem:[#allocation1 + $0x30] sm:$0xff] %vm74_vm0, %v155_v39 }
  0x18   :  { %165 = vst [vmem:[#allocation1 + $0x38] sm:$0xff] %v164_v40  ;;  %v222_v45 = vld [vmem:[#allocation1 + $0x18] sm:$0xff] }
  0x19   :  { %173 = vst.msk [vmem:[#allocation1 + $0x38] sm:$0xff] %vm74_vm0, %v169_v41 }
  0x1a   :  { %217 = vst [vmem:[%s332_s1] sm:$0xff] %v216_v42  ;;  %v224_v46 = vld [vmem:[#allocation1 + $0x20] sm:$0xff] }
  0x1b   :  { %219 = vst [vmem:[%s332_s1 + $0x8] sm:$0xff] %v218_v43 }
  0x1c   :  { %221 = vst [vmem:[%s332_s1 + $0x10] sm:$0xff] %v220_v44  ;;  %v226_v47 = vld [vmem:[#allocation1 + $0x28] sm:$0xff] }
  0x1d   :  { %223 = vst [vmem:[%s332_s1 + $0x18] sm:$0xff] %v222_v45 }
  0x1e   :  { %225 = vst [vmem:[%s332_s1 + $0x20] sm:$0xff] %v224_v46  ;;  %v228_v48 = vld [vmem:[#allocation1 + $0x30] sm:$0xff] }
  0x1f   :  { %227 = vst [vmem:[%s332_s1 + $0x28] sm:$0xff] %v226_v47 }
  0x20   :  { %229 = vst [vmem:[%s332_s1 + $0x30] sm:$0xff] %v228_v48  ;;  %v230_v49 = vld [vmem:[#allocation1 + $0x38] sm:$0xff] }
  0x21   :  { %231 = vst [vmem:[%s332_s1 + $0x38] sm:$0xff] %v230_v49 }

</bundles_post_ra>
